<compile_context>
chip_gen: v7x
topology: tpu7x:2x2x1
jax: 0.10.0
libtpu: 0.0.40
codegen_flags: <defaults>
</compile_context>

<pallas_src>
import jax
import jax.numpy as jnp
from jax.experimental import pallas as pl
from jax.experimental.pallas import tpu as pltpu

_LANE = 128
_SUBLANE_F32 = 8


def _cos_kernel(x_ref, o_ref):
    # Whole-tile load -> elementwise cos -> whole-tile store.
    o_ref[...] = jnp.cos(x_ref[...])


def _target_block_bytes() -> int:
    """HBM-roofline-friendly block size for the current TPU generation."""
    try:
        kind = jax.devices()[0].device_kind.lower()
    except Exception:
        kind = ""
    if "v7" in kind or "7x" in kind:
        # v7x HBM (~3.2 TB/s) makes the fixed ~0.35 us per-step overhead a
        # larger relative tax: use 4 MiB blocks. Double-buffered in+out is
        # 16 MiB, under the 32 MiB scoped-VMEM default (64 MiB physical).
        return 4 << 20
    # v5e / v6e: 2 MiB f32 blocks are already past the ~85% roofline knee.
    return 2 << 20


def custom_act(x: jax.Array, *, block_bytes: int | None = None,
               min_pallas_elems: int = 65536) -> jax.Array:
    """Pallas-TPU equivalent of torch.cos(x) for arbitrary-shaped x."""
    # Non-float / exotic dtypes: defer to XLA (torch.cos would error on ints).
    if not jnp.issubdtype(x.dtype, jnp.floating):
        return jnp.cos(x)
    itemsize = jnp.dtype(x.dtype).itemsize
    if itemsize not in (2, 4):          # f64 / fp8: no benefit, defer to XLA
        return jnp.cos(x)

    n = x.size
    # Tiny inputs (launch + pipeline ramp dominates) and element counts that
    # are not a multiple of 128 lanes: XLA's fused elementwise cos is a
    # single HBM pass — strictly less traffic than any prefix-kernel +
    # slice/pad + concatenate scheme, so it is the performance-correct path.
    if n < min_pallas_elems or n % _LANE != 0:
        return jnp.cos(x)

    orig_shape = x.shape
    dtype = x.dtype
    rows = n // _LANE
    x2d = x.reshape(rows, _LANE)        # zero-copy view of the flat data

    # dtype-aware sublane granularity: (8,128) f32, (16,128) bf16/f16.
    sub = max(_SUBLANE_F32, 32 // itemsize)

    # Size blocks in bytes; no artificial minimum grid-step count.
    bb = block_bytes if block_bytes is not None else _target_block_bytes()
    tr_target = max(sub, (bb // (_LANE * itemsize)) // sub * sub)

    if rows <= tr_target:
        tr = rows                       # single full-array block (always legal)
    else:
        tr = tr_target                  # multiple of `sub`; the cdiv grid
                                        # masks the partial last block
    grid = (pl.cdiv(rows, tr),)

    cost = pl.CostEstimate(
        flops=0,
        transcendentals=n,
        bytes_accessed=2 * n * itemsize,
    )

    out2d = pl.pallas_call(
        _cos_kernel,
        out_shape=jax.ShapeDtypeStruct((rows, _LANE), dtype),
        grid=grid,
        in_specs=[pl.BlockSpec((tr, _LANE), lambda i: (i, 0))],
        out_specs=pl.BlockSpec((tr, _LANE), lambda i: (i, 0)),
        compiler_params=pltpu.CompilerParams(
            dimension_semantics=("parallel",),
        ),
        cost_estimate=cost,
    )(x2d)

    return out2d.reshape(orig_shape)


if __name__ == "__main__":
    key = jax.random.PRNGKey(0)
    k1, k2, k3, k4 = jax.random.split(key, 4)

    # 1) Module-context NCHW shape (2,4,16,16): 2048 elems, 128-aligned.
    #    Default path short-circuits to jnp.cos; forced path runs the kernel.
    x_small = jax.random.normal(k1, (2, 4, 16, 16), dtype=jnp.float32)
    ref_small = jnp.cos(x_small)
    y_def = custom_act(x_small)
    y_ker = custom_act(x_small, min_pallas_elems=0)
    jax.block_until_ready((y_def, y_ker))
    assert y_ker.shape == x_small.shape and y_ker.dtype == x_small.dtype
    assert jnp.max(jnp.abs(y_def - ref_small)) < 1e-6
    assert jnp.max(jnp.abs(y_ker - ref_small)) < 1e-6

    # 2) Multi-step grid with a masked partial last block
    #    (rows=320, tr=128 -> grid=3, last block 64 rows).
    x_mid = jax.random.normal(k2, (2, 4, 40, 128), dtype=jnp.float32)
    y_mid = custom_act(x_mid, min_pallas_elems=0, block_bytes=64 * 1024)
    jax.block_until_ready(y_mid)
    assert jnp.max(jnp.abs(y_mid - jnp.cos(x_mid))) < 1e-6

    # 3) bf16: sublane granularity 16, kernel keeps bf16 end-to-end.
    x_bf = jax.random.normal(k3, (3, 128, 128), dtype=jnp.bfloat16)
    y_bf = custom_act(x_bf, min_pallas_elems=0, block_bytes=32 * 1024)
    jax.block_until_ready(y_bf)
    assert y_bf.dtype == jnp.bfloat16
    assert jnp.max(jnp.abs(y_bf.astype(jnp.float32)
                           - jnp.cos(x_bf).astype(jnp.float32))) < 2e-2

    # 4) Non-128-multiple element count: single-pass XLA fallback correctness.
    x_odd = jax.random.normal(k4, (2, 3, 101, 113), dtype=jnp.float32)
    y_odd = custom_act(x_odd)
    jax.block_until_ready(y_odd)
    assert jnp.max(jnp.abs(y_odd - jnp.cos(x_odd))) < 1e-6

    print("KERNEL_OK")
</pallas_src>

<mosaic_0001>
module attributes {stable_mosaic.version = 11 : i64} {
  func.func @_cos_kernel(%arg0: i32, %arg1: memref<16x128xf32, #tpu.memory_space<vmem>>, %arg2: memref<16x128xf32, #tpu.memory_space<vmem>>) attributes {dimension_semantics = [#tpu.dimension_semantics<parallel>], iteration_bounds = array<i64: 1>, scalar_prefetch = 0 : i64, scratch_operands = 0 : i64, tpu.core_type = #tpu.core_type<tc>, window_params = [{transform_indices = @transform_0, window_bounds = array<i64: 16, 128>}, {transform_indices = @transform_1, window_bounds = array<i64: 16, 128>}]} {
    %c0 = arith.constant 0 : index
    %c0_0 = arith.constant 0 : index
    %0 = vector.load %arg1[%c0, %c0_0] : memref<16x128xf32, #tpu.memory_space<vmem>>, vector<16x128xf32>
    %1 = math.cos %0 : vector<16x128xf32>
    %c0_1 = arith.constant 0 : index
    %c0_2 = arith.constant 0 : index
    %2 = vector.load %arg2[%c0_1, %c0_2] : memref<16x128xf32, #tpu.memory_space<vmem>>, vector<16x128xf32>
    tpu.vector_store %arg2[%c0_1, %c0_2], %1 {strides = array<i32>} : memref<16x128xf32, #tpu.memory_space<vmem>>, vector<16x128xf32>,
    return
  }
  func.func @transform_0(%arg0: i32) -> (i32, i32) {
    %c0_i32 = arith.constant 0 : i32
    %c0_i32_0 = arith.constant 0 : i32
    return %arg0, %c0_i32 : i32, i32
  }
  func.func @transform_1(%arg0: i32) -> (i32, i32) {
    %c0_i32 = arith.constant 0 : i32
    %c0_i32_0 = arith.constant 0 : i32
    return %arg0, %c0_i32 : i32, i32
  }
}

</mosaic_0001>

<bundles_post_ra>
// kernel: tpu_custom_call.1
= control target key start
LH: loop header
LB: loop body
LE: loop exit
PB: predicated region body
PF: predicated region fallthrough
CT: control target
= control target key end

     0   :  { %6 = vsyncpa [#allocation3], 0  ;;  %s468_s0 = inlined_call_operand.hbm [shape: f32[16,128], index: 0, kind: input, shape index: {}]   ;;  %s469_s1 = inlined_call_operand.hbm [shape: f32[16,128], index: 1, kind: output, shape index: {}]  }
   0x1   :  { %7 = vsyncpa [#allocation4], 0  ;;  %s332_s6 = smov [#allocation2]   ;;  %s284_s10 = scalar_lea.hbm %s468_s0, 256 }
   0x2   :  { %s13_s7 = sshll.u32 %s332_s6, 4  ;;  %p285_p0 = scmp.ne.s32.totalorder %s468_s0, %s284_s10  ;;  %s14_s7 = int_to_ptr.vmem [resolvable:$true] %s13_s7 }
   0x3   :  { %p288_p1 = scmp.lt.u32.totalorder %s284_s10, %s468_s0 }
   0x5   :  { %p290_p2 = pnand %p288_p1, %p285_p0 }
   0x7   :  { %293 = shalt.err (!%p290_p2)
}
   0x8   :  { %s294_s15 = scalar_lea.vmem %s14_s7, 256  ;;  %p299_p4 = scmp.lt.s32.totalorder %s14_s7, %s14_s7 }
   0x9   :  { %p295_p3 = scmp.ne.s32.totalorder %s14_s7, %s294_s15  ;;  %p300_p5 = scmp.lt.s32.totalorder %s294_s15, %s294_s15 }
   0xb   :  { %p301_p6 = por %p300_p5, %p299_p4 }
   0xd   :  { %p302_p7 = pnand %p301_p6, %p295_p3 }
   0xf   :  { %305 = shalt.err (!%p302_p7)
}
  0x10   :  { %s333_s16 = smov 128   ;;  %s334_s17 = smov 8  }
  0x11   :  { %19 = dma.hbm_to_vmem [thread:$0]  %s468_s0, 256, %s14_s7, [#allocation3], %s333_s16, %s333_s16, %s334_s17  }
  0x12   :  { %328 = dma.done.wait [#allocation3], 256  }
  0x13   :  { %329 = vsyncadd [#allocation3], 4294967040  ;;  %v367_v0 = vld [vmem:[#allocation2] sm:$0xff]  ;;  %v369_v1 = vld [vmem:[#allocation2 + $0x8] sm:$0xff]  ;;  %v335_v24 = vmov 683565275  }
  0x14   :  { %v25_v2 = vand.u32 2147483647, %v367_v0  ;;  %v28_v3 = vand.u32 2139095040, %v367_v0  ;;  %v128_v4 = vand.u32 2147483647, %v369_v1  ;;  %v131_v5 = vand.u32 2139095040, %v369_v1 }
  0x15   :  { %v336_v26 = vmov 2475754826   ;;  %v337_v28 = vmov 2131351028   ;;  %v338_v30 = vmov 2102212464  }
  0x16   :  { %v29_v6 = vshrl.u32 %v28_v3, 23  ;;  %v32_v7 = vand.u32 8388607, %v25_v2  ;;  %v132_v8 = vshrl.u32 %v131_v5, 23  ;;  %v135_v9 = vand.u32 8388607, %v128_v4 }
  0x17   :  { %v339_v32 = vmov 920167782   ;;  %v340_v40 = vmov 1326507024   ;;  %vm27_vm14 = vcmp.lt.s32.totalorder %v367_v0, 0  ;;  %s341_s0 = smov [#allocation5]  }
  0x18   :  { %v250_v10 = vadd.s32 4294967169, %v29_v6  ;;  %v254_v11 = vadd.s32 4294967169, %v132_v8  ;;  %v33_v13 = vor.u32 8388608, %v32_v7  ;;  %v136_v14 = vor.u32 8388608, %v135_v9  ;;  %s238_s20 = sshll.u32 %s341_s0, 4  ;;  %s239_s20 = int_to_ptr.vmem [resolvable:$true] %s238_s20 }
  0x19   :  { %vm430_vm15 = vcmp.le.f32.partialorder %v25_v2, 0.7853982  ;;  %s306_s21 = scalar_lea.vmem %s239_s20, 256  ;;  %p311_p9 = scmp.lt.s32.totalorder %s239_s20, %s239_s20 }
  0x1a   :  { %v35_v12 = vadd.s32 1, %v250_v10  ;;  %v138_v15 = vadd.s32 1, %v254_v11  ;;  %v379_v20 = vshll.u32 %v33_v13, 8  ;;  %v381_v22 = vshll.u32 %v136_v14, 8  ;;  %p307_p8 = scmp.ne.s32.totalorder %s239_s20, %s306_s21  ;;  %p312_p10 = scmp.lt.s32.totalorder %s306_s21, %s306_s21 }
  0x1c   :  { %vm36_vm0 = vcmp.gt.s32.totalorder %v35_v12, 0  ;;  %vm139_vm1 = vcmp.gt.s32.totalorder %v138_v15, 0  ;;  %p313_p11 = por %p312_p10, %p311_p9 }
  0x1d   :  { %v37_v16 = vsel %vm36_vm0, %v35_v12, 0  ;;  %v140_v19 = vsel %vm139_vm1, %v138_v15, 0  ;;  %vm130_vm0 = vcmp.lt.s32.totalorder %v369_v1, 0  ;;  %vm442_vm1 = vcmp.le.f32.partialorder %v128_v4, 0.7853982 }
  0x1e   :  { %v38_v17 = vshrl.u32 %v37_v16, 5  ;;  %v39_v18 = vand.u32 31, %v37_v16  ;;  %v142_v21 = vand.u32 31, %v140_v19  ;;  %v383_v34 = vshrl.u32 %v140_v19, 5  ;;  %p314_p12 = pnand %p313_p11, %p307_p8 }
  0x20   :  { %v40_v23 = vsub.s32 32, %v39_v18  ;;  %v42_v25 = vshll.u32 %v335_v24, %v39_v18  ;;  %v45_v27 = vshll.u32 %v336_v26, %v39_v18  ;;  %v48_v29 = vshll.u32 %v337_v28, %v39_v18 }
  0x21   :  { %v51_v31 = vshll.u32 %v338_v30, %v39_v18  ;;  %v54_v33 = vshll.u32 %v339_v32, %v39_v18  ;;  %vm57_vm2 = vcmp.lt.s32.totalorder %v38_v17, 1  ;;  %vm58_vm3 = vcmp.lt.s32.totalorder %v38_v17, 2 }
  0x22   :  { %v41_v35 = vshrl.u32 %v335_v24, %v40_v23  ;;  %v43_v36 = vshrl.u32 %v336_v26, %v40_v23  ;;  %v46_v37 = vshrl.u32 %v337_v28, %v40_v23  ;;  %v49_v38 = vshrl.u32 %v338_v30, %v40_v23 }
  0x23   :  { %v52_v39 = vshrl.u32 %v339_v32, %v40_v23  ;;  %v55_v41 = vshrl.u32 %v340_v40, %v40_v23  ;;  %vm60_vm4 = vcmp.lt.s32.totalorder %v38_v17, 4  ;;  %v143_v45 = vsub.s32 32, %v142_v21 }
  0x24   :  { %v44_v42 = vor.u32 %v43_v36, %v42_v25  ;;  %v47_v43 = vor.u32 %v46_v37, %v45_v27  ;;  %v50_v44 = vor.u32 %v49_v38, %v48_v29  ;;  %vm59_vm5 = vcmp.lt.s32.totalorder %v38_v17, 3 }
  0x25   :  { %v53_v46 = vor.u32 %v52_v39, %v51_v31  ;;  %v56_v47 = vor.u32 %v55_v41, %v54_v33  ;;  %v145_v48 = vshll.u32 %v335_v24, %v142_v21  ;;  %v148_v56 = vshll.u32 %v336_v26, %v142_v21 }
  0x26   :  { %v61_v49 = vsel %vm57_vm2, %v41_v35, %v44_v42  ;;  %v62_v50 = vsel %vm60_vm4, %v50_v44, 2102212464  ;;  %v65_v51 = vsel %vm57_vm2, %v44_v42, %v47_v43  ;;  %v69_v52 = vsel %vm57_vm2, %v47_v43, %v50_v44 }
  0x27   :  { %v63_v53 = vsel %vm59_vm5, %v47_v43, %v62_v50  ;;  %v66_v54 = vsel %vm60_vm4, %v53_v46, 920167782  ;;  %v70_v55 = vsel %vm60_vm4, %v56_v47, 1326507024  ;;  %v144_v59 = vshrl.u32 %v335_v24, %v143_v45 }
  0x28   :  { %v67_v57 = vsel %vm59_vm5, %v50_v44, %v66_v54  ;;  %v71_v58 = vsel %vm59_vm5, %v53_v46, %v70_v55  ;;  %v146_v60 = vshrl.u32 %v336_v26, %v143_v45  ;;  %v64_v61 = vsel %vm58_vm3, %v61_v49, %v63_v53 }
  0x29   :  { %v68_v62 = vsel %vm58_vm3, %v65_v51, %v67_v57  ;;  %v72_v63 = vsel %vm58_vm3, %v69_v52, %v71_v58  ;;  %v149_v3 = vshrl.u32 %v337_v28, %v143_v45  ;;  %v151_v11 = vshll.u32 %v337_v28, %v142_v21 }
  0x2a   :  { %v392_v5 = vmul.u32.u64.low %v379_v20, %v72_v63  ;;  %v393_v6 = vmul.u32.u64.high %v379_v20, %v72_v63, %v392_v5  ;;  %v396_v7 = vmul.u32.u64.low %v379_v20, %v68_v62  ;;  %v397_v8 = vmul.u32.u64.high %v379_v20, %v68_v62, %v396_v7 }
  0x2b   :  { %v147_v9 = vor.u32 %v146_v60, %v145_v48  ;;  %v150_v10 = vor.u32 %v149_v3, %v148_v56  ;;  %v152_v12 = vshrl.u32 %v338_v30, %v143_v45  ;;  %v154_v13 = vshll.u32 %v338_v30, %v142_v21 }
  0x2c   :  { %v155_v14 = vshrl.u32 %v339_v32, %v143_v45  ;;  %v157_v15 = vshll.u32 %v339_v32, %v142_v21  ;;  %v158_v16 = vshrl.u32 %v340_v40, %v143_v45  ;;  %v80_v17 = vmul.u32 %v379_v20, %v64_v61 }
  0x2d   :  { %v153_v18 = vor.u32 %v152_v12, %v151_v11  ;;  %vm160_vm6 = vcmp.lt.s32.totalorder %v383_v34, 1  ;;  %vm161_vm7 = vcmp.lt.s32.totalorder %v383_v34, 2  ;;  %vm82_vm8 = vc.u32 %v393_v6, %v396_v7 }
  0x2e   :  { %v83_v19 = vadd.s32 1, %v397_v8  ;;  %v156_v23 = vor.u32 %v155_v14, %v154_v13  ;;  %vm162_vm9 = vcmp.lt.s32.totalorder %v383_v34, 3  ;;  %v159_v24 = vor.u32 %v158_v16, %v157_v15 }
  0x2f   :  { %vm163_vm10 = vcmp.lt.s32.totalorder %v383_v34, 4  ;;  %v164_v25 = vsel %vm160_vm6, %v144_v59, %v147_v9  ;;  %v168_v21 = vsel %vm160_vm6, %v147_v9, %v150_v10  ;;  %v172_v28 = vsel %vm160_vm6, %v150_v10, %v153_v18 }
  0x30   :  { %v84_v26 = vsel %vm82_vm8, %v83_v19, %v397_v8  ;;  %v165_v20 = vsel %vm163_vm10, %v153_v18, 2102212464  ;;  %v169_v27 = vsel %vm163_vm10, %v156_v23, 920167782  ;;  %v173_v32 = vsel %vm163_vm10, %v159_v24, 1326507024 }
  0x31   :  { %v85_v29 = vadd.s32 %v84_v26, %v80_v17  ;;  %v166_v30 = vsel %vm162_vm9, %v150_v10, %v165_v20  ;;  %v170_v31 = vsel %vm162_vm9, %v153_v18, %v169_v27  ;;  %v174_v36 = vsel %vm162_vm9, %v156_v23, %v173_v32 }
  0x32   :  { %v167_v33 = vsel %vm161_vm7, %v164_v25, %v166_v30  ;;  %v171_v35 = vsel %vm161_vm7, %v168_v21, %v170_v31  ;;  %v175_v38 = vsel %vm161_vm7, %v172_v28, %v174_v36  ;;  %v81_v57 = vadd.s32 %v396_v7, %v393_v6 }
  0x33   :  { %v86_v37 = vadd.s32 536870912, %v85_v29  ;;  %v414_v39 = vmul.u32.u64.low %v381_v22, %v171_v35  ;;  %v415_v40 = vmul.u32.u64.high %v381_v22, %v171_v35, %v414_v39  ;;  %v183_v44 = vmul.u32 %v381_v22, %v167_v33 }
  0x34   :  { %v418_v41 = vmul.u32.u64.low %v381_v22, %v175_v38  ;;  %v419_v42 = vmul.u32.u64.high %v381_v22, %v175_v38, %v418_v41  ;;  %vm117_vm5 = vweird.f32 %v367_v0  ;;  %vm220_vm9 = vweird.f32 %v369_v1 }
  0x35   :  { %v87_v43 = vshrl.u32 %v86_v37, 30  ;;  %v186_v46 = vadd.s32 1, %v415_v40 }
  0x36   :  { %vm185_vm11 = vc.u32 %v419_v42, %v414_v39  ;;  %v184_v13 = vadd.s32 %v414_v39, %v419_v42 }
  0x37   :  { %v88_v45 = vshll.u32 %v87_v43, 30  ;;  %v187_v34 = vsel %vm185_vm11, %v186_v46, %v415_v40  ;;  %v111_v25 = vsub.s32 4, %v87_v43 }
  0x38   :  { %v188_v48 = vadd.s32 %v187_v34, %v183_v44 }
  0x39   :  { %v89_v47 = vsub.s32 %v85_v29, %v88_v45  ;;  %v112_v30 = vsel %vm27_vm14, %v111_v25, %v87_v43 }
  0x3a   :  { %v189_v50 = vadd.s32 536870912, %v188_v48  ;;  %v114_v2 = vsel %vm430_vm15, 0, %v112_v30 }
  0x3b   :  { %v91_v49 = vsub.s32 0, %v89_v47  ;;  %v118_v37 = vand.u32 3, %v114_v2 }
  0x3c   :  { %v190_v52 = vshrl.u32 %v189_v50, 30 }
  0x3d   :  { %v251_v51 = vmin.u32 %v91_v49, %v89_v47  ;;  %vm123_vm2 = vcmp.eq.s32.totalorder %v118_v37, 2  ;;  %vm120_vm3 = vcmp.eq.s32.totalorder %v118_v37, 0  ;;  %vm119_vm4 = vcmp.lt.s32.totalorder %v118_v37, 2 }
  0x3e   :  { %v191_v54 = vshll.u32 %v190_v52, 30  ;;  %v214_v36 = vsub.s32 4, %v190_v52 }
  0x3f   :  { %v93_v53 = vclz %v251_v51 }
  0x40   :  { %v192_v56 = vsub.s32 %v188_v48, %v191_v54  ;;  %v215_v40 = vsel %vm130_vm0, %v214_v36, %v190_v52 }
  0x41   :  { %v252_v55 = vadd.s32 4294967294, %v93_v53  ;;  %v217_v44 = vsel %vm442_vm1, 0, %v215_v40 }
  0x42   :  { %v194_v58 = vsub.s32 0, %v192_v56  ;;  %v221_v34 = vand.u32 3, %v217_v44 }
  0x43   :  { %vm253_vm12 = vcmp.lt.s32.totalorder %v252_v55, 0 }
  0x44   :  { %v96_v22 = vsel %vm253_vm12, 0, %v252_v55  ;;  %v255_v62 = vmin.u32 %v194_v58, %v192_v56  ;;  %vm226_vm6 = vcmp.eq.s32.totalorder %v221_v34, 2  ;;  %vm223_vm7 = vcmp.eq.s32.totalorder %v221_v34, 0 }
  0x45   :  { %v97_v59 = vsub.s32 32, %v96_v22  ;;  %v98_v60 = vshll.u32 %v89_v47, %v96_v22  ;;  %v101_v61 = vsub.s32 4294967266, %v96_v22  ;;  %vm222_vm8 = vcmp.lt.s32.totalorder %v221_v34, 2 }
  0x46   :  { %v196_v5 = vclz %v255_v62 }
  0x47   :  { %v99_v63 = vshrl.u32 %v81_v57, %v97_v59  ;;  %v102_v3 = vadd.s32 127, %v101_v61 }
  0x48   :  { %v256_v10 = vadd.s32 4294967294, %v196_v5 }
  0x49   :  { %v100_v8 = vor.u32 %v99_v63, %v98_v60  ;;  %v103_v9 = vshll.u32 %v102_v3, 23 }
  0x4a   :  { %vm257_vm13 = vcmp.lt.s32.totalorder %v256_v10, 0 }
  0x4b   :  { %v104_v11 = vor.u32 4788187, %v103_v9  ;;  %v107_v12 = vcvt.s32.f32 %v100_v8  ;;  %v199_v6 = vsel %vm257_vm13, 0, %v256_v10 }
  0x4c   :  { %v200_v7 = vsub.s32 32, %v199_v6  ;;  %v201_v15 = vshll.u32 %v192_v56, %v199_v6  ;;  %v204_v16 = vsub.s32 4294967266, %v199_v6 }
  0x4d   :  { %v105_v14 = vand.u32 2147483647, %v104_v11 }
  0x4e   :  { %v202_v18 = vshrl.u32 %v184_v13, %v200_v7  ;;  %v205_v19 = vadd.s32 127, %v204_v16 }
  0x4f   :  { %v108_v17 = vmul.f32 %v107_v12, %v105_v14 }
  0x50   :  { %v203_v21 = vor.u32 %v202_v18, %v201_v15  ;;  %v206_v26 = vshll.u32 %v205_v19, 23 }
  0x51   :  { %v109_v24 = vxor.u32 2147483648, %v108_v17 }
  0x52   :  { %v207_v28 = vor.u32 4788187, %v206_v26  ;;  %v210_v29 = vcvt.s32.f32 %v203_v21 }
  0x53   :  { %v110_v20 = vsel %vm27_vm14, %v109_v24, %v108_v17 }
  0x54   :  { %v113_v27 = vsel %vm430_vm15, %v367_v0, %v110_v20  ;;  %v208_v31 = vand.u32 2147483647, %v207_v28 }
  0x55   :  { %276 = vcosq.f32 %v113_v27 }
  0x56   :  { %278 = vsinq.f32 %v113_v27  ;;  %v211_v32 = vmul.f32 %v210_v29, %v208_v31 }
  0x58   :  { %v212_v35 = vxor.u32 2147483648, %v211_v32 }
  0x5a   :  { %v213_v38 = vsel %vm130_vm0, %v212_v35, %v211_v32 }
  0x5b   :  { %v216_v39 = vsel %vm442_vm1, %v369_v1, %v213_v38 }
  0x5c   :  { %280 = vcosq.f32 %v216_v39 }
  0x5d   :  { %282 = vsinq.f32 %v216_v39 }
  0x5f   :  { %v277_v41 = vpop.eup %276 }
  0x60   :  { %v279_v42 = vpop.eup %278  ;;  %v124_v43 = vxor.u32 2147483648, %v277_v41 }
  0x61   :  { %v121_v4 = vxor.u32 2147483648, %v279_v42 }
  0x62   :  { %v125_v45 = vsel %vm123_vm2, %v124_v43, %v279_v42 }
  0x63   :  { %v122_v46 = vsel %vm120_vm3, %v277_v41, %v121_v4 }
  0x64   :  { %v126_v47 = vsel %vm119_vm4, %v122_v46, %v125_v45 }
  0x65   :  { %v127_v48 = vsel %vm117_vm5, nan, %v126_v47 }
  0x66   :  { %231 = vst [vmem:[#allocation5] sm:$0xff] %v127_v48  ;;  %v281_v49 = vpop.eup %280 }
  0x67   :  { %v283_v50 = vpop.eup %282  ;;  %v227_v51 = vxor.u32 2147483648, %v281_v49 }
  0x68   :  { %v224_v52 = vxor.u32 2147483648, %v283_v50 }
  0x69   :  { %v228_v53 = vsel %vm226_vm6, %v227_v51, %v283_v50 }
  0x6a   :  { %v225_v54 = vsel %vm223_vm7, %v281_v49, %v224_v52 }
  0x6b   :  { %v229_v0 = vsel %vm222_vm8, %v225_v54, %v228_v53 }
  0x6c   :  { %v230_v55 = vsel %vm220_vm9, nan, %v229_v0 }
  0x6d   :  { %232 = vst [vmem:[#allocation5 + $0x8] sm:$0xff] %v230_v55 }
  0x6e   :  { %317 = shalt.err (!%p314_p12)
}
  0x6f   :  { %s318_s24 = scalar_lea.hbm %s469_s1, 256 }
  0x70   :  { %p319_p13 = scmp.ne.s32.totalorder %s469_s1, %s318_s24  ;;  %p322_p0 = scmp.lt.u32.totalorder %s318_s24, %s469_s1 }
  0x72   :  { %p324_p1 = pnand %p322_p0, %p319_p13 }
  0x74   :  { %327 = shalt.err (!%p324_p1)
}
  0x75   :  { %244 = dma.vmem_to_hbm [thread:$0]  %s239_s20, 256, %s469_s1, [#allocation4], %s333_s16, %s333_s16, %s334_s17  }
  0x76   :  { %330 = dma.done.wait [#allocation4], 256  }
  0x77   :  { %331 = vsyncadd [#allocation4], 4294967040 }
  0x78   :  { %248 = vsyncpa [#allocation3], 1 }
  0x79   :  { %249 = vsyncpa [#allocation4], 1 }

</bundles_post_ra>
